<compile_context>
chip_gen: v6e
topology: v6e:2x2x1
jax: 0.10.0
libtpu: 0.0.40
codegen_flags: <defaults>
</compile_context>

<pallas_src>
import functools

import jax
import jax.numpy as jnp
from jax.experimental import pallas as pl
from jax.experimental.pallas import tpu as pltpu


def _round_up(x, m):
    return (x + m - 1) // m * m


def actor_kernel(x_ref, w1_ref, b1_ref, w2_ref, b2_ref, w3_ref, b3_ref,
                 o_ref, *, max_action):
    x = x_ref[...]                                            # f32 (tm, obs)
    # fc1 + ReLU  (bf16 MXU, f32 accumulate; epilogue in f32 on the VPU)
    h1 = jnp.dot(x.astype(w1_ref.dtype), w1_ref[...],
                 preferred_element_type=jnp.float32)
    h1 = jnp.maximum(h1 + b1_ref[...], 0.0)
    # fc2 + ReLU
    h2 = jnp.dot(h1.astype(w2_ref.dtype), w2_ref[...],
                 preferred_element_type=jnp.float32)
    h2 = jnp.maximum(h2 + b2_ref[...], 0.0)
    # fc3 + tanh * max_action  (lane-dense padded N; EUP tanh, f32 throughout)
    out = jnp.dot(h2.astype(w3_ref.dtype), w3_ref[...],
                  preferred_element_type=jnp.float32)
    out = out + b3_ref[...]
    o_ref[...] = (jnp.tanh(out) * max_action).astype(o_ref.dtype)


def actor_forward(x, params, max_action, *, block_b=256):
    """x: (B, obs_dim) float32. Returns (B, action_dim) float32."""
    w1, b1, w2, b2, w3, b3 = params
    B, obs_dim = x.shape
    hidden = w1.shape[1]
    action_dim = w3.shape[1]

    # Lane-dense output: pad action_dim (and w3/b3) up to a multiple of 128.
    ad_pad = _round_up(action_dim, 128)
    if ad_pad != action_dim:
        w3 = jnp.pad(w3, ((0, 0), (0, ad_pad - action_dim)))
        b3 = jnp.pad(b3, ((0, 0), (0, ad_pad - action_dim)))

    # Batch tiling: single tile for small B, 256-row tiles (parallel axis) for
    # large B so h1/h2 vreg/VMEM pressure stays bounded and both v7x TCs work.
    tm = min(block_b, _round_up(B, 8))
    b_pad = _round_up(B, tm)
    if b_pad != B:
        x = jnp.pad(x, ((0, b_pad - B), (0, 0)))
    grid = (b_pad // tm,)

    # NOTE: max_action is baked statically; if it varies at runtime pass it as
    # an SMEM scalar instead to avoid retraces.
    kernel = functools.partial(actor_kernel, max_action=float(max_action))

    flops = 2 * b_pad * (obs_dim * hidden + hidden * hidden + hidden * ad_pad)
    bytes_accessed = int(
        sum(a.size * a.dtype.itemsize for a in (x, w1, b1, w2, b2, w3, b3))
        + b_pad * ad_pad * 4)
    cost = pl.CostEstimate(flops=flops,
                           transcendentals=b_pad * ad_pad,
                           bytes_accessed=bytes_accessed)

    out = pl.pallas_call(
        kernel,
        out_shape=jax.ShapeDtypeStruct((b_pad, ad_pad), jnp.float32),
        grid_spec=pltpu.PrefetchScalarGridSpec(
            num_scalar_prefetch=0,
            grid=grid,
            in_specs=[
                pl.BlockSpec((tm, obs_dim), lambda i: (i, 0)),      # x tile
                pl.BlockSpec((obs_dim, hidden), lambda i: (0, 0)),  # w1 (resident)
                pl.BlockSpec((1, hidden), lambda i: (0, 0)),        # b1
                pl.BlockSpec((hidden, hidden), lambda i: (0, 0)),   # w2
                pl.BlockSpec((1, hidden), lambda i: (0, 0)),        # b2
                pl.BlockSpec((hidden, ad_pad), lambda i: (0, 0)),   # w3 (padded)
                pl.BlockSpec((1, ad_pad), lambda i: (0, 0)),        # b3 (padded)
            ],
            out_specs=pl.BlockSpec((tm, ad_pad), lambda i: (i, 0)),
        ),
        compiler_params=pltpu.CompilerParams(
            dimension_semantics=("parallel",)),
        cost_estimate=cost,
    )(x, w1, b1, w2, b2, w3, b3)

    return out[:B, :action_dim]


def init_params(key, obs_dim, action_dim, hidden=256):
    """Deterministic synthetic parameters (PyTorch-Linear-like uniform init).

    Weights are stored bf16 (halves the only non-trivial HBM traffic, native
    MXU dtype on all generations); biases stay f32 for the f32 epilogue.
    """
    ks = jax.random.split(key, 6)

    def lin(kw, kb, fan_in, fan_out):
        bound = 1.0 / jnp.sqrt(fan_in)
        w = jax.random.uniform(kw, (fan_in, fan_out), jnp.float32, -bound, bound)
        b = jax.random.uniform(kb, (1, fan_out), jnp.float32, -bound, bound)
        return w.astype(jnp.bfloat16), b

    w1, b1 = lin(ks[0], ks[1], obs_dim, hidden)
    w2, b2 = lin(ks[2], ks[3], hidden, hidden)
    w3, b3 = lin(ks[4], ks[5], hidden, action_dim)
    return (w1, b1, w2, b2, w3, b3)


def actor_ref(x, params, max_action):
    """Pure-JAX reference doing the same bf16-weight / f32-accumulate math."""
    w1, b1, w2, b2, w3, b3 = params

    def lin(a, w, b):
        return jnp.dot(a.astype(w.dtype), w,
                       preferred_element_type=jnp.float32) + b

    h = jnp.maximum(lin(x, w1, b1), 0.0)
    h = jnp.maximum(lin(h, w2, b2), 0.0)
    return jnp.tanh(lin(h, w3, b3)) * max_action


if __name__ == "__main__":
    obs_dim = 16
    action_dim = 8
    max_action = 2.0

    key = jax.random.PRNGKey(0)
    k_params, k_x1, k_x2 = jax.random.split(key, 3)
    params = init_params(k_params, obs_dim, action_dim)

    # Small batch (single grid point, full-array blocks).
    x_small = jax.random.normal(k_x1, (2, obs_dim), jnp.float32)
    out_small = jax.block_until_ready(actor_forward(x_small, params, max_action))
    ref_small = actor_ref(x_small, params, max_action)
    assert out_small.shape == (2, action_dim)
    assert jnp.allclose(out_small, ref_small, atol=1e-3, rtol=1e-3)

    # Larger batch (exercises the batch-tiled, parallel-axis grid path).
    x_big = jax.random.normal(k_x2, (512, obs_dim), jnp.float32)
    out_big = jax.block_until_ready(actor_forward(x_big, params, max_action))
    ref_big = actor_ref(x_big, params, max_action)
    assert out_big.shape == (512, action_dim)
    assert jnp.allclose(out_big, ref_big, atol=1e-3, rtol=1e-3)

    print("KERNEL_OK")
</pallas_src>

<mosaic_0001>
module attributes {stable_mosaic.version = 11 : i64} {
  func.func @actor_kernel(%arg0: i32, %arg1: memref<8x16xf32, #tpu.memory_space<vmem>>, %arg2: memref<16x256xbf16, #tpu.memory_space<vmem>>, %arg3: memref<1x256xf32, #tpu.memory_space<vmem>>, %arg4: memref<256x256xbf16, #tpu.memory_space<vmem>>, %arg5: memref<1x256xf32, #tpu.memory_space<vmem>>, %arg6: memref<256x128xbf16, #tpu.memory_space<vmem>>, %arg7: memref<1x128xf32, #tpu.memory_space<vmem>>, %arg8: memref<8x128xf32, #tpu.memory_space<vmem>>) attributes {dimension_semantics = [#tpu.dimension_semantics<parallel>], iteration_bounds = array<i64: 1>, scalar_prefetch = 0 : i64, scratch_operands = 0 : i64, tpu.core_type = #tpu.core_type<tc>, window_params = [{transform_indices = @transform_0, window_bounds = array<i64: 8, 16>}, {pipeline_mode = #tpu.pipeline_mode<synchronous>, transform_indices = @transform_1, window_bounds = array<i64: 16, 256>}, {pipeline_mode = #tpu.pipeline_mode<synchronous>, transform_indices = @transform_2, window_bounds = array<i64: 1, 256>}, {pipeline_mode = #tpu.pipeline_mode<synchronous>, transform_indices = @transform_3, window_bounds = array<i64: 256, 256>}, {pipeline_mode = #tpu.pipeline_mode<synchronous>, transform_indices = @transform_4, window_bounds = array<i64: 1, 256>}, {pipeline_mode = #tpu.pipeline_mode<synchronous>, transform_indices = @transform_5, window_bounds = array<i64: 256, 128>}, {pipeline_mode = #tpu.pipeline_mode<synchronous>, transform_indices = @transform_6, window_bounds = array<i64: 1, 128>}, {transform_indices = @transform_7, window_bounds = array<i64: 8, 128>}]} {
    %c0 = arith.constant 0 : index
    %c0_0 = arith.constant 0 : index
    %0 = vector.load %arg1[%c0, %c0_0] : memref<8x16xf32, #tpu.memory_space<vmem>>, vector<8x16xf32>
    %1 = arith.truncf %0 : vector<8x16xf32> to vector<8x16xbf16>
    %c0_1 = arith.constant 0 : index
    %c0_2 = arith.constant 0 : index
    %2 = vector.load %arg2[%c0_1, %c0_2] : memref<16x256xbf16, #tpu.memory_space<vmem>>, vector<16x256xbf16>
    %cst = arith.constant dense<0.000000e+00> : vector<8x256xf32>
    %3 = tpu.matmul %1, %2, %cst {dimension_numbers = #tpu.dot_dimension_numbers<[1], [0], [0], [1], [0, 0, 1, 1], [], []>} : vector<8x16xbf16>, vector<16x256xbf16>, vector<8x256xf32> -> vector<8x256xf32>
    %c0_3 = arith.constant 0 : index
    %c0_4 = arith.constant 0 : index
    %4 = vector.load %arg3[%c0_3, %c0_4] : memref<1x256xf32, #tpu.memory_space<vmem>>, vector<1x256xf32>
    %5 = vector.broadcast %4 : vector<1x256xf32> to vector<8x256xf32>
    %6 = arith.addf %3, %5 : vector<8x256xf32>
    %cst_5 = arith.constant 0.000000e+00 : f32
    %7 = vector.broadcast %cst_5 : f32 to vector<8x256xf32>
    %8 = arith.maximumf %6, %7 : vector<8x256xf32>
    %9 = arith.truncf %8 : vector<8x256xf32> to vector<8x256xbf16>
    %c0_6 = arith.constant 0 : index
    %c0_7 = arith.constant 0 : index
    %10 = vector.load %arg4[%c0_6, %c0_7] : memref<256x256xbf16, #tpu.memory_space<vmem>>, vector<256x256xbf16>
    %cst_8 = arith.constant dense<0.000000e+00> : vector<8x256xf32>
    %11 = tpu.matmul %9, %10, %cst_8 {dimension_numbers = #tpu.dot_dimension_numbers<[1], [0], [0], [1], [0, 0, 1, 1], [], []>} : vector<8x256xbf16>, vector<256x256xbf16>, vector<8x256xf32> -> vector<8x256xf32>
    %c0_9 = arith.constant 0 : index
    %c0_10 = arith.constant 0 : index
    %12 = vector.load %arg5[%c0_9, %c0_10] : memref<1x256xf32, #tpu.memory_space<vmem>>, vector<1x256xf32>
    %13 = vector.broadcast %12 : vector<1x256xf32> to vector<8x256xf32>
    %14 = arith.addf %11, %13 : vector<8x256xf32>
    %cst_11 = arith.constant 0.000000e+00 : f32
    %15 = vector.broadcast %cst_11 : f32 to vector<8x256xf32>
    %16 = arith.maximumf %14, %15 : vector<8x256xf32>
    %17 = arith.truncf %16 : vector<8x256xf32> to vector<8x256xbf16>
    %c0_12 = arith.constant 0 : index
    %c0_13 = arith.constant 0 : index
    %18 = vector.load %arg6[%c0_12, %c0_13] : memref<256x128xbf16, #tpu.memory_space<vmem>>, vector<256x128xbf16>
    %cst_14 = arith.constant dense<0.000000e+00> : vector<8x128xf32>
    %19 = tpu.matmul %17, %18, %cst_14 {dimension_numbers = #tpu.dot_dimension_numbers<[1], [0], [0], [1], [0, 0, 1, 1], [], []>} : vector<8x256xbf16>, vector<256x128xbf16>, vector<8x128xf32> -> vector<8x128xf32>
    %c0_15 = arith.constant 0 : index
    %c0_16 = arith.constant 0 : index
    %20 = vector.load %arg7[%c0_15, %c0_16] : memref<1x128xf32, #tpu.memory_space<vmem>>, vector<1x128xf32>
    %21 = vector.broadcast %20 : vector<1x128xf32> to vector<8x128xf32>
    %22 = arith.addf %19, %21 : vector<8x128xf32>
    %23 = math.tanh %22 : vector<8x128xf32>
    %cst_17 = arith.constant 2.000000e+00 : f32
    %24 = vector.broadcast %cst_17 : f32 to vector<8x128xf32>
    %25 = arith.mulf %23, %24 : vector<8x128xf32>
    %c0_18 = arith.constant 0 : index
    %c0_19 = arith.constant 0 : index
    %26 = vector.load %arg8[%c0_18, %c0_19] : memref<8x128xf32, #tpu.memory_space<vmem>>, vector<8x128xf32>
    tpu.vector_store %arg8[%c0_18, %c0_19], %25 {strides = array<i32>} : memref<8x128xf32, #tpu.memory_space<vmem>>, vector<8x128xf32>,
    return
  }
  func.func @transform_0(%arg0: i32) -> (i32, i32) {
    %c0_i32 = arith.constant 0 : i32
    %c0_i32_0 = arith.constant 0 : i32
    return %arg0, %c0_i32 : i32, i32
  }
  func.func @transform_1(%arg0: i32) -> (i32, i32) {
    %c0_i32 = arith.constant 0 : i32
    %c0_i32_0 = arith.constant 0 : i32
    %c0_i32_1 = arith.constant 0 : i32
    return %c0_i32, %c0_i32_0 : i32, i32
  }
  func.func @transform_2(%arg0: i32) -> (i32, i32) {
    %c0_i32 = arith.constant 0 : i32
    %c0_i32_0 = arith.constant 0 : i32
    %c0_i32_1 = arith.constant 0 : i32
    return %c0_i32, %c0_i32_0 : i32, i32
  }
  func.func @transform_3(%arg0: i32) -> (i32, i32) {
    %c0_i32 = arith.constant 0 : i32
    %c0_i32_0 = arith.constant 0 : i32
    %c0_i32_1 = arith.constant 0 : i32
    return %c0_i32, %c0_i32_0 : i32, i32
  }
  func.func @transform_4(%arg0: i32) -> (i32, i32) {
    %c0_i32 = arith.constant 0 : i32
    %c0_i32_0 = arith.constant 0 : i32
    %c0_i32_1 = arith.constant 0 : i32
    return %c0_i32, %c0_i32_0 : i32, i32
  }
  func.func @transform_5(%arg0: i32) -> (i32, i32) {
    %c0_i32 = arith.constant 0 : i32
    %c0_i32_0 = arith.constant 0 : i32
    %c0_i32_1 = arith.constant 0 : i32
    return %c0_i32, %c0_i32_0 : i32, i32
  }
  func.func @transform_6(%arg0: i32) -> (i32, i32) {
    %c0_i32 = arith.constant 0 : i32
    %c0_i32_0 = arith.constant 0 : i32
    %c0_i32_1 = arith.constant 0 : i32
    return %c0_i32, %c0_i32_0 : i32, i32
  }
  func.func @transform_7(%arg0: i32) -> (i32, i32) {
    %c0_i32 = arith.constant 0 : i32
    %c0_i32_0 = arith.constant 0 : i32
    return %arg0, %c0_i32 : i32, i32
  }
}

</mosaic_0001>

<bundles_post_ra>
// kernel: tpu_custom_call.1
= control target key start
LH: loop header
LB: loop body
LE: loop exit
PB: predicated region body
PF: predicated region fallthrough
CT: control target
= control target key end

     0   :  { %12 = vsyncpa [#allocation3], 0  ;;  %s935_s0 = inlined_call_operand.hbm [shape: f32[8,16], index: 0, kind: input, shape index: {}]   ;;  %s936_s1 = inlined_call_operand.hbm [shape: bf16[16,256], index: 1, kind: input, shape index: {}]   ;;  %s937_s2 = inlined_call_operand.vmem [shape: f32[1,256], index: 2, kind: input, shape index: {}]   ;;  %s938_s3 = inlined_call_operand.hbm [shape: bf16[256,256], index: 3, kind: input, shape index: {}]   ;;  %s939_s4 = inlined_call_operand.vmem [shape: f32[1,256], index: 4, kind: input, shape index: {}]   ;;  %s940_s5 = inlined_call_operand.hbm [shape: bf16[256,128], index: 5, kind: input, shape index: {}]   ;;  %s941_s6 = inlined_call_operand.vmem [shape: f32[1,128], index: 6, kind: input, shape index: {}]   ;;  %s942_s7 = inlined_call_operand.hbm [shape: f32[8,128], index: 7, kind: output, shape index: {}]  }
   0x1   :  { %13 = vsyncpa [#allocation6], 0 }
   0x2   :  { %14 = vsyncpa [#allocation9], 0 }
   0x3   :  { %15 = vsyncpa [#allocation4], 0  ;;  %s861_s24 = smov [#allocation5]  }
   0x4   :  { %s31_s25 = sshll.u32 %s861_s24, 4  ;;  %s32_s25 = int_to_ptr.vmem [resolvable:$true] %s31_s25 }
   0x5   :  { %s761_s26 = scalar_lea.vmem %s32_s25, 256  ;;  %p766_p1 = scmp.lt.s32.totalorder %s32_s25, %s32_s25 }
   0x6   :  { %p762_p0 = scmp.ne.s32.totalorder %s32_s25, %s761_s26  ;;  %p767_p2 = scmp.lt.s32.totalorder %s761_s26, %s761_s26 }
   0x8   :  { %p768_p3 = por %p767_p2, %p766_p1 }
   0xa   :  { %p769_p4 = pnand %p768_p3, %p762_p0 }
   0xc   :  { %772 = shalt.err (!%p769_p4)
}
   0xd   :  { %s862_s27 = smov 128   ;;  %s863_s28 = smov 8  }
   0xe   :  { %37 = dma.hbm_to_vmem [thread:$0]  %s936_s1, 256, %s32_s25, [#allocation6], %s862_s27, %s862_s27, %s863_s28  }
   0xf   :  { %s864_s8 = smov [#allocation2]   ;;  %s865_s10 = smov [#allocation7]  }
  0x10   :  { %s22_s9 = sshll.u32 %s864_s8, 4  ;;  %s45_s11 = sshll.u32 %s865_s10, 4  ;;  %s23_s9 = int_to_ptr.vmem [resolvable:$true] %s22_s9  ;;  %s46_s11 = int_to_ptr.vmem [resolvable:$true] %s45_s11 }
  0x11   :  { %s781_s12 = scalar_lea.vmem %s23_s9, 128  ;;  %p786_p6 = scmp.lt.s32.totalorder %s23_s9, %s23_s9 }
  0x12   :  { %p782_p5 = scmp.ne.s32.totalorder %s23_s9, %s781_s12  ;;  %p787_p7 = scmp.lt.s32.totalorder %s781_s12, %s781_s12 }
  0x14   :  { %p788_p8 = por %p787_p7, %p786_p6 }
  0x16   :  { %p789_p9 = pnand %p788_p8, %p782_p5 }
  0x18   :  { %792 = shalt.err (!%p789_p9)
}
  0x19   :  { %25 = dma.hbm_to_vmem [thread:$0]  %s935_s0, 128, %s23_s9, [#allocation3]  }
  0x1a   :  { %s801_s15 = scalar_lea.vmem %s46_s11, 4096  ;;  %p806_p11 = scmp.lt.s32.totalorder %s46_s11, %s46_s11 }
  0x1b   :  { %p802_p10 = scmp.ne.s32.totalorder %s46_s11, %s801_s15  ;;  %p807_p12 = scmp.lt.s32.totalorder %s801_s15, %s801_s15 }
  0x1d   :  { %p808_p13 = por %p807_p12, %p806_p11 }
  0x1f   :  { %p809_p0 = pnand %p808_p13, %p802_p10 }
  0x21   :  { %812 = shalt.err (!%p809_p0)
}
  0x22   :  { %51 = dma.hbm_to_vmem [thread:$0]  %s938_s3, 4096, %s46_s11, [#allocation6], %s862_s27, %s862_s27, %s863_s28  }
  0x23   :  { %s866_s17 = smov [#allocation8]  }
  0x24   :  { %s59_s18 = sshll.u32 %s866_s17, 4  ;;  %s60_s18 = int_to_ptr.vmem [resolvable:$true] %s59_s18 }
  0x25   :  { %s821_s19 = scalar_lea.vmem %s60_s18, 2048  ;;  %p826_p2 = scmp.lt.s32.totalorder %s60_s18, %s60_s18 }
  0x26   :  { %p822_p1 = scmp.ne.s32.totalorder %s60_s18, %s821_s19  ;;  %p827_p3 = scmp.lt.s32.totalorder %s821_s19, %s821_s19 }
  0x28   :  { %p828_p4 = por %p827_p3, %p826_p2 }
  0x2a   :  { %p829_p5 = pnand %p828_p4, %p822_p1 }
  0x2c   :  { %832 = shalt.err (!%p829_p5)
}
  0x2d   :  { %s867_s0 = smov 64   ;;  %s868_s20 = smov 4  }
  0x2e   :  { %65 = dma.hbm_to_vmem [thread:$0]  %s940_s5, 2048, %s60_s18, [#allocation9], %s867_s0, %s867_s0, %s868_s20  }
  0x2f   :  { %853 = dma.done.wait [#allocation3], 128  }
  0x30   :  { %854 = vsyncadd [#allocation3], 4294967168 }
  0x31   :  { %855 = dma.done.wait [#allocation6], 4352  }
  0x32   :  { %856 = vsyncadd [#allocation6], 4294962944 }
  0x33   :  { %857 = dma.done.wait [#allocation9], 2048  }
  0x34   :  { %858 = vsyncadd [#allocation9], 4294965248  ;;  %v869_v0 = vmov 0   ;;  %v684_v1 = vld [vmem:[#allocation5 + $0x4] ss:$8 sps:$4 sm:$0xff]   ;;  %v81_v3 = vld [vmem:[#allocation2] sm:$0xff]  ;;  %v87_v49 = vlaneseq }
  0x35   :  { %143 = vmatprep.mubr.bf16.mxu0 %v869_v0  ;;  %v686_v2 = vld [vmem:[#allocation5] ss:$8 sps:$4 sm:$0xff]   ;;  %125 = vmatprep.subr.bf16.mxu0 %v684_v1  ;;  %v82_v4 = vpack.c.bf16 %v81_v3, %v81_v3  ;;  %v687_v5 = vld [vmem:[#allocation7 + $0x74] ss:$8 sps:$4 sm:$0xff]   ;;  %vm107_vm0 = vcmask 130048   ;;  %v739_v41 = vld [vmem:[#allocation8 + $0x68] sm:$0xff]  }
  0x36   :  { %v689_v6 = vld [vmem:[#allocation7 + $0x70] ss:$8 sps:$4 sm:$0xff]   ;;  %126 = vmatpush1.bf16.msra.mxu0 %v686_v2  ;;  %v690_v7 = vld [vmem:[#allocation7 + $0x64] ss:$8 sps:$4 sm:$0xff]   ;;  %360 = vmatprep.subr.bf16.mxu1 %v687_v5  ;;  %v692_v8 = vld [vmem:[#allocation7 + $0x60] ss:$8 sps:$4 sm:$0xff]  }
  0x37   :  { %361 = vmatpush1.bf16.msra.mxu1 %v689_v6  ;;  %v693_v9 = vld [vmem:[#allocation7 + $0x54] ss:$8 sps:$4 sm:$0xff]   ;;  %v695_v10 = vld [vmem:[#allocation7 + $0x50] ss:$8 sps:$4 sm:$0xff]   ;;  %v696_v11 = vld [vmem:[#allocation7 + $0x44] ss:$8 sps:$4 sm:$0xff]  }
  0x38   :  { %362 = vmatprep.subr.bf16.mxu1 %v690_v7  ;;  %v698_v12 = vld [vmem:[#allocation7 + $0x40] ss:$8 sps:$4 sm:$0xff]   ;;  %v699_v13 = vld [vmem:[#allocation7 + $0x34] ss:$8 sps:$4 sm:$0xff]   ;;  %v701_v14 = vld [vmem:[#allocation7 + $0x30] ss:$8 sps:$4 sm:$0xff]  }
  0x39   :  { %602 = vmatmul.mubr.msk.bf16.vlgmr.msra.gmra.mxu0 %vm107_vm0, %v82_v4  ;;  %v702_v15 = vld [vmem:[#allocation7 + $0x24] ss:$8 sps:$4 sm:$0xff]   ;;  %v704_v16 = vld [vmem:[#allocation7 + $0x20] ss:$8 sps:$4 sm:$0xff]   ;;  %v705_v17 = vld [vmem:[#allocation7 + $0x14] ss:$8 sps:$4 sm:$0xff]  }
  0x3a   :  { %v707_v18 = vld [vmem:[#allocation7 + $0x10] ss:$8 sps:$4 sm:$0xff]   ;;  %v708_v19 = vld [vmem:[#allocation7 + $0x4] ss:$8 sps:$4 sm:$0xff]   ;;  %v710_v20 = vld [vmem:[#allocation7] ss:$8 sps:$4 sm:$0xff]  }
  0x3b   :  { %363 = vmatpush1.bf16.msra.mxu1 %v692_v8  ;;  %v711_v21 = vld [vmem:[#allocation7 + $0xf4] ss:$8 sps:$4 sm:$0xff]   ;;  %v713_v22 = vld [vmem:[#allocation7 + $0xf0] ss:$8 sps:$4 sm:$0xff]   ;;  %v714_v23 = vld [vmem:[#allocation7 + $0xe4] ss:$8 sps:$4 sm:$0xff]  }
  0x3c   :  { %364 = vmatprep.subr.bf16.mxu1 %v693_v9  ;;  %v716_v24 = vld [vmem:[#allocation7 + $0xe0] ss:$8 sps:$4 sm:$0xff]   ;;  %v717_v25 = vld [vmem:[#allocation7 + $0xd4] ss:$8 sps:$4 sm:$0xff]   ;;  %v719_v26 = vld [vmem:[#allocation7 + $0xd0] ss:$8 sps:$4 sm:$0xff]  }
  0x3d   :  { %v720_v27 = vld [vmem:[#allocation7 + $0xc4] ss:$8 sps:$4 sm:$0xff]   ;;  %v722_v28 = vld [vmem:[#allocation7 + $0xc0] ss:$8 sps:$4 sm:$0xff]   ;;  %v723_v29 = vld [vmem:[#allocation7 + $0xb4] ss:$8 sps:$4 sm:$0xff]  }
  0x3e   :  { %v725_v30 = vld [vmem:[#allocation7 + $0xb0] ss:$8 sps:$4 sm:$0xff]   ;;  %v726_v31 = vld [vmem:[#allocation7 + $0xa4] ss:$8 sps:$4 sm:$0xff]   ;;  %v728_v32 = vld [vmem:[#allocation7 + $0xa0] ss:$8 sps:$4 sm:$0xff]  }
  0x3f   :  { %365 = vmatpush1.bf16.msra.mxu1 %v695_v10  ;;  %v729_v33 = vld [vmem:[#allocation7 + $0x94] ss:$8 sps:$4 sm:$0xff]   ;;  %v731_v34 = vld [vmem:[#allocation7 + $0x90] ss:$8 sps:$4 sm:$0xff]   ;;  %v732_v35 = vld [vmem:[#allocation7 + $0x84] ss:$8 sps:$4 sm:$0xff]  }
  0x40   :  { %366 = vmatprep.subr.bf16.mxu1 %v696_v11  ;;  %v734_v36 = vld [vmem:[#allocation7 + $0x80] ss:$8 sps:$4 sm:$0xff]   ;;  %v735_v37 = vld [vmem:[#allocation8 + $0x78] sm:$0xff]   ;;  %v737_v39 = vld [vmem:[#allocation8 + $0x70] sm:$0xff]   ;;  %v88_v50 = vshrl.u32 %v87_v49, 7 }
  0x41   :  { %v736_v38 = vld [vmem:[#allocation8 + $0x38] sm:$0xff]   ;;  %652 = vmatprep.subr.bf16.mxu0 %v735_v37  ;;  %v738_v40 = vld [vmem:[#allocation8 + $0x30] sm:$0xff]   ;;  %v740_v42 = vld [vmem:[#allocation8 + $0x28] sm:$0xff]  }
  0x42   :  { %653 = vmatpush3.bf16.msra.mxu0 %v736_v38  ;;  %v741_v43 = vld [vmem:[#allocation8 + $0x60] sm:$0xff]   ;;  %v743_v45 = vld [vmem:[#allocation8 + $0x58] sm:$0xff]   ;;  %v745_v47 = vld [vmem:[#allocation8 + $0x50] sm:$0xff]   ;;  %v89_v51 = vsub.s32 0, %v88_v50  ;;  %v93_v53 = vsub.s32 1, %v88_v50 }
  0x43   :  { %367 = vmatpush1.bf16.msra.mxu1 %v698_v12  ;;  %654 = vmatprep.subr.bf16.mxu0 %v737_v39  ;;  %v742_v44 = vld [vmem:[#allocation8 + $0x20] sm:$0xff]   ;;  %v744_v46 = vld [vmem:[#allocation8 + $0x18] sm:$0xff]   ;;  %v746_v48 = vld [vmem:[#allocation8 + $0x10] sm:$0xff]  }
  0x44   :  { %368 = vmatprep.subr.bf16.mxu1 %v699_v13  ;;  %v85_v52 = vld [vmem:[%s937_s2] sm:$0x3]  ;;  %v749_v4 = vld [vmem:[#allocation8 + $0x40] sm:$0xff]  }
  0x45   :  { %v90_v54 = vrot.slane %v85_v52, %v89_v51  ;;  %v94_v55 = vrot.slane %v85_v52, %v93_v53  ;;  %v747_v2 = vld [vmem:[#allocation8 + $0x48] sm:$0xff]   ;;  %v750_v5 = vld [vmem:[#allocation8] sm:$0xff]  }
  0x46   :  { %655 = vmatpush3.bf16.msra.mxu0 %v738_v40  ;;  %v748_v3 = vld [vmem:[#allocation8 + $0x8] sm:$0xff]  }
  0x47   :  { %369 = vmatpush1.bf16.msra.mxu1 %v701_v14  ;;  %656 = vmatprep.subr.bf16.mxu0 %v739_v41  ;;  %v188_v6 = vld [vmem:[%s939_s4] sm:$0x3]  ;;  %s870_s4 = smov [#allocation10]  }
  0x48   :  { %370 = vmatprep.subr.bf16.mxu1 %v702_v15  ;;  %v193_v7 = vrot.slane %v188_v6, %v89_v51  ;;  %v197_v8 = vrot.slane %v188_v6, %v93_v53  ;;  %s589_s26 = sshll.u32 %s870_s4, 4  ;;  %s590_s26 = int_to_ptr.vmem [resolvable:$true] %s589_s26 }
  0x49   :  { %s833_s27 = scalar_lea.vmem %s590_s26, 128  ;;  %p838_p7 = scmp.lt.s32.totalorder %s590_s26, %s590_s26 }
  0x4a   :  { %657 = vmatpush3.bf16.msra.mxu0 %v740_v42  ;;  %p834_p6 = scmp.ne.s32.totalorder %s590_s26, %s833_s27  ;;  %p839_p8 = scmp.lt.s32.totalorder %s833_s27, %s833_s27 }
  0x4b   :  { %371 = vmatpush1.bf16.msra.mxu1 %v704_v16  ;;  %658 = vmatprep.subr.bf16.mxu0 %v741_v43 }
  0x4c   :  { %372 = vmatprep.subr.bf16.mxu1 %v705_v17  ;;  %p840_p9 = por %p839_p8, %p838_p7 }
  0x4e   :  { %659 = vmatpush3.bf16.msra.mxu0 %v742_v44  ;;  %p841_p10 = pnand %p840_p9, %p834_p6 }
  0x4f   :  { %373 = vmatpush1.bf16.msra.mxu1 %v707_v18  ;;  %660 = vmatprep.subr.bf16.mxu0 %v743_v45 }
  0x50   :  { %374 = vmatprep.subr.bf16.mxu1 %v708_v19 }
  0x52   :  { %661 = vmatpush3.bf16.msra.mxu0 %v744_v46 }
  0x53   :  { %375 = vmatpush1.bf16.msra.mxu1 %v710_v20  ;;  %662 = vmatprep.subr.bf16.mxu0 %v745_v47  ;;  %v635_v20 = vld [vmem:[%s941_s6] ss:$0 sm:$0xff] }
  0x54   :  { %376 = vmatprep.subr.bf16.mxu1 %v711_v21 }
  0x56   :  { %663 = vmatpush3.bf16.msra.mxu0 %v746_v48 }
  0x57   :  { %377 = vmatpush2.bf16.msra.mxu1 %v713_v22  ;;  %664 = vmatprep.subr.bf16.mxu0 %v747_v2 }
  0x58   :  { %378 = vmatprep.subr.bf16.mxu1 %v714_v23 }
  0x5a   :  { %665 = vmatpush3.bf16.msra.mxu0 %v748_v3 }
  0x5b   :  { %379 = vmatpush2.bf16.msra.mxu1 %v716_v24  ;;  %666 = vmatprep.subr.bf16.mxu0 %v749_v4 }
  0x5c   :  { %380 = vmatprep.subr.bf16.mxu1 %v717_v25 }
  0x5e   :  { %667 = vmatpush3.bf16.msra.mxu0 %v750_v5 }
  0x5f   :  { %381 = vmatpush2.bf16.msra.mxu1 %v719_v26 }
  0x60   :  { %382 = vmatprep.subr.bf16.mxu1 %v720_v27 }
  0x63   :  { %383 = vmatpush2.bf16.msra.mxu1 %v722_v28 }
  0x64   :  { %384 = vmatprep.subr.bf16.mxu1 %v723_v29 }
  0x67   :  { %385 = vmatpush2.bf16.msra.mxu1 %v725_v30 }
  0x68   :  { %386 = vmatprep.subr.bf16.mxu1 %v726_v31 }
  0x6b   :  { %387 = vmatpush2.bf16.msra.mxu1 %v728_v32 }
  0x6c   :  { %388 = vmatprep.subr.bf16.mxu1 %v729_v33 }
  0x6f   :  { %389 = vmatpush2.bf16.msra.mxu1 %v731_v34 }
  0x70   :  { %390 = vmatprep.subr.bf16.mxu1 %v732_v35 }
  0x73   :  { %391 = vmatpush2.bf16.msra.mxu1 %v734_v36 }
  0xf9   :  { %v145_v56 = vpop.f32.mrf.mxu0 }
  0xfa   :  { %v146_v57 = vadd.f32 %v145_v56, %v90_v54 }
  0xfb   :  { %v147_v58 = vpop.f32.mrf.mxu0 }
  0xfc   :  { %v148_v59 = vadd.f32 %v147_v58, %v94_v55  ;;  %v152_v60 = vmax.f32 %v146_v57, 0.0 }
  0xfd   :  { %v149_v61 = vpop.f32.mrf.mxu0 }
  0xfe   :  { %v153_v62 = vmax.f32 %v148_v59, 0.0  ;;  %v154_v1 = vpack.c.bf16 %v152_v60, %v152_v60 }
  0xff   :  { %v150_v63 = vpop.f32.mrf.mxu0 }
 0x100   :  { %v155_v0 = vpack.c.bf16 %v153_v62, %v153_v62 }
 0x102   :  { %392 = vmatprep.mubr.bf16.mxu1 %v155_v0 }
 0x103   :  { %393 = vmatmul.mubr.bf16.vlgmr.msra.gmra.mxu1 %v154_v1 }
 0x1c3   :  { %v394_v9 = vpop.f32.mrf.mxu1 }
 0x1c4   :  { %v395_v10 = vadd.f32 %v394_v9, %v193_v7 }
 0x1c5   :  { %v396_v11 = vpop.f32.mrf.mxu1 }
 0x1c6   :  { %v397_v12 = vadd.f32 %v396_v11, %v197_v8  ;;  %v401_v13 = vmax.f32 %v395_v10, 0.0 }
 0x1c7   :  { %v398_v14 = vpop.f32.mrf.mxu1 }
 0x1c8   :  { %v402_v15 = vmax.f32 %v397_v12, 0.0  ;;  %v403_v18 = vpack.c.bf16 %v401_v13, %v401_v13 }
 0x1c9   :  { %v399_v16 = vpop.f32.mrf.mxu1 }
 0x1ca   :  { %v404_v17 = vpack.c.bf16 %v402_v15, %v402_v15 }
 0x1cc   :  { %572 = vmatprep.mubr.bf16.mxu0 %v404_v17 }
 0x1cd   :  { %573 = vmatmul.mubr.bf16.vlgmr.msra.gmra.mxu0 %v403_v18 }
 0x28d   :  { %v668_v19 = vpop.f32.mrf.mxu0 }
 0x28f   :  { %v669_v21 = vpop.f32.mrf.mxu0 }
 0x290   :  { %v670_v22 = vadd.f32 %v669_v21, %v668_v19 }
 0x291   :  { %v671_v23 = vpop.f32.mrf.mxu0 }
 0x292   :  { %v575_v24 = vadd.f32 %v670_v22, %v635_v20 }
 0x293   :  { %v672_v25 = vpop.f32.mrf.mxu0 }
 0x294   :  { %751 = vtanh.f32 %v575_v24 }
 0x2a1   :  { %v752_v26 = vpop.eup %751 }
 0x2a2   :  { %v581_v27 = vmul.f32 2.0, %v752_v26 }
 0x2a4   :  { %582 = vst [vmem:[#allocation10] sm:$0xff] %v581_v27 }
 0x2a5   :  { %844 = shalt.err (!%p841_p10)
}
 0x2a6   :  { %592 = dma.vmem_to_hbm [thread:$0]  %s590_s26, 128, %s942_s7, [#allocation4]  }
 0x2a7   :  { %859 = dma.done.wait [#allocation4], 128  }
 0x2a8   :  { %860 = vsyncadd [#allocation4], 4294967168 }
 0x2a9   :  { %596 = vsyncpa [#allocation3], 1 }
 0x2aa   :  { %597 = vsyncpa [#allocation6], 1 }
 0x2ab   :  { %598 = vsyncpa [#allocation9], 1 }
 0x2ac   :  { %599 = vsyncpa [#allocation4], 1 }

</bundles_post_ra>
